<compile_context>
chip_gen: v7x
topology: tpu7x:2x2x1
jax: 0.10.0
libtpu: 0.0.40
codegen_flags: <defaults>
</compile_context>

<pallas_src>
import jax
import jax.numpy as jnp
from jax.experimental import pallas as pl
from jax.experimental.pallas import tpu as pltpu

_MB = 1024 * 1024


def _round_up(x: int, m: int) -> int:
    return (x + m - 1) // m * m


def _cdiv(a: int, b: int) -> int:
    return -(-a // b)


# --------------------------------------------------------------------------
# Kernels
# --------------------------------------------------------------------------
def _mlp_kernel_resident(x_ref, wg_ref, bg_ref, wu_ref, bu_ref, wd_ref, bd_ref,
                         o_ref):
    """All weights VMEM-resident; one sequence tile per grid step."""
    x = x_ref[...]
    gate = jnp.dot(x, wg_ref[...], preferred_element_type=jnp.float32)
    gate = gate + bg_ref[...].astype(jnp.float32)
    up = jnp.dot(x, wu_ref[...], preferred_element_type=jnp.float32)
    up = up + bu_ref[...].astype(jnp.float32)
    act = (gate * jax.nn.sigmoid(gate)) * up            # SiLU(gate) * up, f32
    out = jnp.dot(act.astype(wd_ref.dtype), wd_ref[...],
                  preferred_element_type=jnp.float32)
    o_ref[...] = (out + bd_ref[...].astype(jnp.float32)).astype(o_ref.dtype)


def _mlp_kernel_tiled(x_ref, wg_ref, bg_ref, wu_ref, bu_ref, wd_ref, bd_ref,
                      o_ref, acc_ref):
    """Intermediate-dim tiled variant: accumulate down-proj partials in f32."""
    k = pl.program_id(1)

    x = x_ref[...]
    gate = jnp.dot(x, wg_ref[...], preferred_element_type=jnp.float32)
    gate = gate + bg_ref[...].astype(jnp.float32)
    up = jnp.dot(x, wu_ref[...], preferred_element_type=jnp.float32)
    up = up + bu_ref[...].astype(jnp.float32)
    act = (gate * jax.nn.sigmoid(gate)) * up
    partial = jnp.dot(act.astype(wd_ref.dtype), wd_ref[...],
                      preferred_element_type=jnp.float32)

    @pl.when(k == 0)
    def _first():                       # direct write: no zero-fill + RMW
        acc_ref[...] = partial

    @pl.when(k > 0)
    def _accumulate():
        acc_ref[...] += partial

    @pl.when(k == pl.num_programs(1) - 1)
    def _finalize():
        o_ref[...] = (acc_ref[...]
                      + bd_ref[...].astype(jnp.float32)).astype(o_ref.dtype)


# --------------------------------------------------------------------------
# Wrapper
# --------------------------------------------------------------------------
def qwen25_vl_vision_mlp(hidden_states, wg, bg, wu, bu, wd, bd, *,
                         tm=512, ti=None, vmem_budget_mb=42):
    """SwiGLU vision MLP: down( silu(gate(x)) * up(x) ).

    hidden_states: [S, H]
    wg, wu: [H, I]   bg, bu: [1, I]   (column-parallel shard of gate/up proj)
    wd:     [I, H]   bd:     [1, H]   (row-parallel shard of down proj)

    ti=None  -> automatic: weights kept VMEM-resident when they fit the
                budget, otherwise the intermediate dim is tiled.
    ti=<int> -> force the intermediate-dim-tiled (streaming) path.
    """
    S, H = hidden_states.shape
    I = wg.shape[1]
    assert wu.shape == (H, I) and wd.shape == (I, H)
    assert bg.shape == (1, I) and bu.shape == (1, I) and bd.shape == (1, H)

    out_dtype = hidden_states.dtype
    x_it = jnp.dtype(hidden_states.dtype).itemsize
    w_it = jnp.dtype(wg.dtype).itemsize
    o_it = jnp.dtype(out_dtype).itemsize
    budget = int(vmem_budget_mb) * _MB
    # Safe on all generations: <= v7x's 64 MiB/TC, well under v5e/v6e's 128 MiB.
    vmem_limit = int(min(96 * _MB, max(48 * _MB, budget + 8 * _MB)))

    # ---- sequence tiling ---------------------------------------------------
    def _seq_plan(tm_req):
        smin = _round_up(S, 8)
        tm_r = max(8, _round_up(tm_req, 8))
        tm_e = tm_r if smin >= tm_r else smin   # default tm is a 256-multiple
        sp = _round_up(S, tm_e)
        return tm_e, sp, sp // tm_e

    tm_eff, Sp, ns = _seq_plan(tm)

    # ---- resident-weight feasibility ----------------------------------------
    def _resident_bytes(tm_):
        wbytes = 3 * H * I * w_it                              # single-buffered
        bbytes = 2 * I * jnp.dtype(bg.dtype).itemsize + H * jnp.dtype(bd.dtype).itemsize
        xo = 2 * tm_ * H * (x_it + o_it)                       # double-buffered
        inter = tm_ * I * (4 + 4 + w_it) + tm_ * H * 4         # f32 gate/up + cast + out
        return wbytes + bbytes + xo + inter

    use_resident = (ti is None) and (_resident_bytes(tm_eff) <= budget)
    if (ti is None) and (not use_resident) and tm_eff > 256:
        # Try a smaller sequence tile before giving up on weight residency.
        tm_try, Sp_try, ns_try = _seq_plan(256)
        if _resident_bytes(tm_try) <= budget:
            use_resident = True
            tm_eff, Sp, ns = tm_try, Sp_try, ns_try

    x_p = (jnp.pad(hidden_states, ((0, Sp - S), (0, 0)))
           if Sp != S else hidden_states)

    if use_resident:
        # ---- weights live whole in VMEM; fetched from HBM exactly once ------
        cost = pl.CostEstimate(
            flops=6 * Sp * H * I,
            transcendentals=Sp * I,
            bytes_accessed=(Sp * H * (x_it + o_it)
                            + 3 * H * I * w_it + (2 * I + H) * w_it),
        )
        out = pl.pallas_call(
            _mlp_kernel_resident,
            out_shape=jax.ShapeDtypeStruct((Sp, H), out_dtype),
            grid_spec=pltpu.PrefetchScalarGridSpec(
                num_scalar_prefetch=0,
                grid=(ns,),
                in_specs=[
                    pl.BlockSpec((tm_eff, H), lambda i: (i, 0)),          # x
                    pl.BlockSpec(memory_space=pltpu.MemorySpace.VMEM),    # wg
                    pl.BlockSpec(memory_space=pltpu.MemorySpace.VMEM),    # bg
                    pl.BlockSpec(memory_space=pltpu.MemorySpace.VMEM),    # wu
                    pl.BlockSpec(memory_space=pltpu.MemorySpace.VMEM),    # bu
                    pl.BlockSpec(memory_space=pltpu.MemorySpace.VMEM),    # wd
                    pl.BlockSpec(memory_space=pltpu.MemorySpace.VMEM),    # bd
                ],
                out_specs=pl.BlockSpec((tm_eff, H), lambda i: (i, 0)),
            ),
            compiler_params=pltpu.CompilerParams(
                dimension_semantics=("parallel",),
                vmem_limit_bytes=vmem_limit),
            cost_estimate=cost,
        )(x_p, wg, bg, wu, bu, wd, bd)
        return out[:S] if Sp != S else out

    # ---- streaming path: tile the intermediate dimension --------------------
    Ip128 = _round_up(I, 128)
    if ti is not None:
        ti_eff = min(max(128, _round_up(ti, 128)), Ip128)
    else:
        def _tiled_bytes(ti_):
            wbytes = 2 * 3 * H * ti_ * w_it                    # double-buffered
            xo = 2 * tm_eff * H * (x_it + o_it)
            acc = tm_eff * H * 4
            inter = tm_eff * ti_ * (4 + 4 + w_it) + tm_eff * H * 4
            return wbytes + xo + acc + inter
        ti_eff = 128
        for cand in (1024, 896, 768, 640, 512, 384, 256, 128):
            if cand <= Ip128 and _tiled_bytes(cand) <= budget:
                ti_eff = cand
                break

    nk = _cdiv(Ip128, ti_eff)
    ti_eff = _round_up(_cdiv(Ip128, nk), 128)   # minimize padding of I
    Ip = nk * ti_eff
    pad_i = Ip - I

    if pad_i:
        # Zero padding is mathematically inert: silu(0)*0 == 0, padded wd rows
        # are zero.  (For the real model I is already lane-aligned -> no pad.)
        wg_p = jnp.pad(wg, ((0, 0), (0, pad_i)))
        wu_p = jnp.pad(wu, ((0, 0), (0, pad_i)))
        bg_p = jnp.pad(bg, ((0, 0), (0, pad_i)))
        bu_p = jnp.pad(bu, ((0, 0), (0, pad_i)))
        wd_p = jnp.pad(wd, ((0, pad_i), (0, 0)))
    else:
        wg_p, wu_p, bg_p, bu_p, wd_p = wg, wu, bg, bu, wd

    weight_passes = 1 if nk == 1 else ns   # constant block index is not re-fetched
    cost = pl.CostEstimate(
        flops=6 * Sp * H * Ip,
        transcendentals=Sp * Ip,
        bytes_accessed=(Sp * H * (x_it + o_it)
                        + weight_passes * 3 * H * Ip * w_it
                        + (2 * Ip + H) * w_it),
    )

    out = pl.pallas_call(
        _mlp_kernel_tiled,
        out_shape=jax.ShapeDtypeStruct((Sp, H), out_dtype),
        grid_spec=pltpu.PrefetchScalarGridSpec(
            num_scalar_prefetch=0,
            grid=(ns, nk),                                       # seq outer, I inner
            in_specs=[
                pl.BlockSpec((tm_eff, H), lambda i, k: (i, 0)),  # x seq tile
                pl.BlockSpec((H, ti_eff), lambda i, k: (0, k)),  # gate weight tile
                pl.BlockSpec((1, ti_eff), lambda i, k: (0, k)),  # gate bias tile
                pl.BlockSpec((H, ti_eff), lambda i, k: (0, k)),  # up weight tile
                pl.BlockSpec((1, ti_eff), lambda i, k: (0, k)),  # up bias tile
                pl.BlockSpec((ti_eff, H), lambda i, k: (k, 0)),  # down weight tile
                pl.BlockSpec((1, H), lambda i, k: (0, 0)),       # down bias
            ],
            out_specs=pl.BlockSpec((tm_eff, H), lambda i, k: (i, 0)),
            scratch_shapes=[pltpu.VMEM((tm_eff, H), jnp.float32)],
        ),
        compiler_params=pltpu.CompilerParams(
            dimension_semantics=("parallel", "arbitrary"),
            vmem_limit_bytes=vmem_limit),
        cost_estimate=cost,
    )(x_p, wg_p, bg_p, wu_p, bu_p, wd_p, bd)

    return out[:S] if Sp != S else out


def reference_mlp(x, wg, bg, wu, bu, wd, bd):
    xf = x.astype(jnp.float32)
    gate = xf @ wg.astype(jnp.float32) + bg.astype(jnp.float32)
    up = xf @ wu.astype(jnp.float32) + bu.astype(jnp.float32)
    act = gate * jax.nn.sigmoid(gate) * up
    out = act @ wd.astype(jnp.float32) + bd.astype(jnp.float32)
    return out.astype(x.dtype)


if __name__ == "__main__":
    # ---- Test 1: f32, small ragged shapes -> resident-weight path ---------
    S, H, I = 10, 32, 48
    ks = jax.random.split(jax.random.PRNGKey(0), 8)
    x = jax.random.normal(ks[0], (S, H), jnp.float32)
    wg = jax.random.normal(ks[1], (H, I), jnp.float32) * 0.05
    bg = jax.random.normal(ks[2], (1, I), jnp.float32) * 0.05
    wu = jax.random.normal(ks[3], (H, I), jnp.float32) * 0.05
    bu = jax.random.normal(ks[4], (1, I), jnp.float32) * 0.05
    wd = jax.random.normal(ks[5], (I, H), jnp.float32) * 0.05
    bd = jax.random.normal(ks[6], (1, H), jnp.float32) * 0.05

    out = jax.block_until_ready(qwen25_vl_vision_mlp(x, wg, bg, wu, bu, wd, bd))
    ref = reference_mlp(x, wg, bg, wu, bu, wd, bd)
    assert out.shape == (S, H)
    assert jnp.allclose(out, ref, atol=2e-3, rtol=2e-3), "f32 mismatch vs reference"

    # ---- Test 2: bf16, forced streaming path (multi-tile grid + I accum) --
    S2, H2, I2 = 300, 64, 320
    ks2 = jax.random.split(jax.random.PRNGKey(1), 8)
    x2 = jax.random.normal(ks2[0], (S2, H2), jnp.float32).astype(jnp.bfloat16)
    wg2 = (jax.random.normal(ks2[1], (H2, I2), jnp.float32) * 0.05).astype(jnp.bfloat16)
    bg2 = (jax.random.normal(ks2[2], (1, I2), jnp.float32) * 0.05).astype(jnp.bfloat16)
    wu2 = (jax.random.normal(ks2[3], (H2, I2), jnp.float32) * 0.05).astype(jnp.bfloat16)
    bu2 = (jax.random.normal(ks2[4], (1, I2), jnp.float32) * 0.05).astype(jnp.bfloat16)
    wd2 = (jax.random.normal(ks2[5], (I2, H2), jnp.float32) * 0.05).astype(jnp.bfloat16)
    bd2 = (jax.random.normal(ks2[6], (1, H2), jnp.float32) * 0.05).astype(jnp.bfloat16)

    out2 = jax.block_until_ready(
        qwen25_vl_vision_mlp(x2, wg2, bg2, wu2, bu2, wd2, bd2, tm=128, ti=128))
    ref2 = reference_mlp(x2, wg2, bg2, wu2, bu2, wd2, bd2)
    assert out2.shape == (S2, H2)
    assert jnp.allclose(out2.astype(jnp.float32), ref2.astype(jnp.float32),
                        atol=5e-2, rtol=5e-2), "bf16 tiled mismatch vs reference"

    # ---- Test 3: bf16, auto path (resident weights, 2 sequence tiles) -----
    S3, H3, I3 = 640, 128, 384
    ks3 = jax.random.split(jax.random.PRNGKey(2), 8)
    x3 = jax.random.normal(ks3[0], (S3, H3), jnp.float32).astype(jnp.bfloat16)
    wg3 = (jax.random.normal(ks3[1], (H3, I3), jnp.float32) * 0.05).astype(jnp.bfloat16)
    bg3 = (jax.random.normal(ks3[2], (1, I3), jnp.float32) * 0.05).astype(jnp.bfloat16)
    wu3 = (jax.random.normal(ks3[3], (H3, I3), jnp.float32) * 0.05).astype(jnp.bfloat16)
    bu3 = (jax.random.normal(ks3[4], (1, I3), jnp.float32) * 0.05).astype(jnp.bfloat16)
    wd3 = (jax.random.normal(ks3[5], (I3, H3), jnp.float32) * 0.05).astype(jnp.bfloat16)
    bd3 = (jax.random.normal(ks3[6], (1, H3), jnp.float32) * 0.05).astype(jnp.bfloat16)

    out3 = jax.block_until_ready(
        qwen25_vl_vision_mlp(x3, wg3, bg3, wu3, bu3, wd3, bd3))
    ref3 = reference_mlp(x3, wg3, bg3, wu3, bu3, wd3, bd3)
    assert out3.shape == (S3, H3)
    assert jnp.allclose(out3.astype(jnp.float32), ref3.astype(jnp.float32),
                        atol=5e-2, rtol=5e-2), "bf16 resident mismatch vs reference"

    print("KERNEL_OK")
</pallas_src>

<mosaic_0001>
module attributes {stable_mosaic.version = 11 : i64} {
  func.func @_mlp_kernel_resident(%arg0: i32, %arg1: memref<16x32xf32, #tpu.memory_space<vmem>>, %arg2: memref<32x48xf32, #tpu.memory_space<vmem>>, %arg3: memref<1x48xf32, #tpu.memory_space<vmem>>, %arg4: memref<32x48xf32, #tpu.memory_space<vmem>>, %arg5: memref<1x48xf32, #tpu.memory_space<vmem>>, %arg6: memref<48x32xf32, #tpu.memory_space<vmem>>, %arg7: memref<1x32xf32, #tpu.memory_space<vmem>>, %arg8: memref<16x32xf32, #tpu.memory_space<vmem>>) attributes {dimension_semantics = [#tpu.dimension_semantics<parallel>], iteration_bounds = array<i64: 1>, scalar_prefetch = 0 : i64, scratch_operands = 0 : i64, tpu.core_type = #tpu.core_type<tc>, window_params = [{transform_indices = @transform_0, window_bounds = array<i64: 16, 32>}, {pipeline_mode = #tpu.pipeline_mode<synchronous>, transform_indices = @transform_1, window_bounds = array<i64: 32, 48>}, {pipeline_mode = #tpu.pipeline_mode<synchronous>, transform_indices = @transform_2, window_bounds = array<i64: 1, 48>}, {pipeline_mode = #tpu.pipeline_mode<synchronous>, transform_indices = @transform_3, window_bounds = array<i64: 32, 48>}, {pipeline_mode = #tpu.pipeline_mode<synchronous>, transform_indices = @transform_4, window_bounds = array<i64: 1, 48>}, {pipeline_mode = #tpu.pipeline_mode<synchronous>, transform_indices = @transform_5, window_bounds = array<i64: 48, 32>}, {pipeline_mode = #tpu.pipeline_mode<synchronous>, transform_indices = @transform_6, window_bounds = array<i64: 1, 32>}, {transform_indices = @transform_7, window_bounds = array<i64: 16, 32>}]} {
    %c0 = arith.constant 0 : index
    %c0_0 = arith.constant 0 : index
    %0 = vector.load %arg1[%c0, %c0_0] : memref<16x32xf32, #tpu.memory_space<vmem>>, vector<16x32xf32>
    %c0_1 = arith.constant 0 : index
    %c0_2 = arith.constant 0 : index
    %1 = vector.load %arg2[%c0_1, %c0_2] : memref<32x48xf32, #tpu.memory_space<vmem>>, vector<32x48xf32>
    %cst = arith.constant dense<0.000000e+00> : vector<16x48xf32>
    %2 = tpu.matmul %0, %1, %cst {dimension_numbers = #tpu.dot_dimension_numbers<[1], [0], [0], [1], [0, 0, 1, 1], [], []>} : vector<16x32xf32>, vector<32x48xf32>, vector<16x48xf32> -> vector<16x48xf32>
    %c0_3 = arith.constant 0 : index
    %c0_4 = arith.constant 0 : index
    %3 = vector.load %arg3[%c0_3, %c0_4] : memref<1x48xf32, #tpu.memory_space<vmem>>, vector<1x48xf32>
    %4 = vector.broadcast %3 : vector<1x48xf32> to vector<16x48xf32>
    %5 = arith.addf %2, %4 : vector<16x48xf32>
    %c0_5 = arith.constant 0 : index
    %c0_6 = arith.constant 0 : index
    %6 = vector.load %arg4[%c0_5, %c0_6] : memref<32x48xf32, #tpu.memory_space<vmem>>, vector<32x48xf32>
    %cst_7 = arith.constant dense<0.000000e+00> : vector<16x48xf32>
    %7 = tpu.matmul %0, %6, %cst_7 {dimension_numbers = #tpu.dot_dimension_numbers<[1], [0], [0], [1], [0, 0, 1, 1], [], []>} : vector<16x32xf32>, vector<32x48xf32>, vector<16x48xf32> -> vector<16x48xf32>
    %c0_8 = arith.constant 0 : index
    %c0_9 = arith.constant 0 : index
    %8 = vector.load %arg5[%c0_8, %c0_9] : memref<1x48xf32, #tpu.memory_space<vmem>>, vector<1x48xf32>
    %9 = vector.broadcast %8 : vector<1x48xf32> to vector<16x48xf32>
    %10 = arith.addf %7, %9 : vector<16x48xf32>
    %11 = arith.negf %5 : vector<16x48xf32>
    %12 = math.exp %11 : vector<16x48xf32>
    %cst_10 = arith.constant 1.000000e+00 : f32
    %13 = vector.broadcast %cst_10 : f32 to vector<16x48xf32>
    %14 = arith.addf %13, %12 : vector<16x48xf32>
    %15 = arith.divf %13, %14 : vector<16x48xf32>
    %16 = arith.mulf %5, %15 : vector<16x48xf32>
    %17 = arith.mulf %16, %10 : vector<16x48xf32>
    %c0_11 = arith.constant 0 : index
    %c0_12 = arith.constant 0 : index
    %18 = vector.load %arg6[%c0_11, %c0_12] : memref<48x32xf32, #tpu.memory_space<vmem>>, vector<48x32xf32>
    %cst_13 = arith.constant dense<0.000000e+00> : vector<16x32xf32>
    %19 = tpu.matmul %17, %18, %cst_13 {dimension_numbers = #tpu.dot_dimension_numbers<[1], [0], [0], [1], [0, 0, 1, 1], [], []>} : vector<16x48xf32>, vector<48x32xf32>, vector<16x32xf32> -> vector<16x32xf32>
    %c0_14 = arith.constant 0 : index
    %c0_15 = arith.constant 0 : index
    %20 = vector.load %arg7[%c0_14, %c0_15] : memref<1x32xf32, #tpu.memory_space<vmem>>, vector<1x32xf32>
    %21 = vector.broadcast %20 : vector<1x32xf32> to vector<16x32xf32>
    %22 = arith.addf %19, %21 : vector<16x32xf32>
    %c0_16 = arith.constant 0 : index
    %c0_17 = arith.constant 0 : index
    %23 = vector.load %arg8[%c0_16, %c0_17] : memref<16x32xf32, #tpu.memory_space<vmem>>, vector<16x32xf32>
    tpu.vector_store %arg8[%c0_16, %c0_17], %22 {strides = array<i32>} : memref<16x32xf32, #tpu.memory_space<vmem>>, vector<16x32xf32>,
    return
  }
  func.func @transform_0(%arg0: i32) -> (i32, i32) {
    %c0_i32 = arith.constant 0 : i32
    %c0_i32_0 = arith.constant 0 : i32
    return %arg0, %c0_i32 : i32, i32
  }
  func.func @transform_1(%arg0: i32) -> (i32, i32) {
    %c0_i32 = arith.constant 0 : i32
    %c0_i32_0 = arith.constant 0 : i32
    %c0_i32_1 = arith.constant 0 : i32
    return %c0_i32, %c0_i32_0 : i32, i32
  }
  func.func @transform_2(%arg0: i32) -> (i32, i32) {
    %c0_i32 = arith.constant 0 : i32
    %c0_i32_0 = arith.constant 0 : i32
    %c0_i32_1 = arith.constant 0 : i32
    return %c0_i32, %c0_i32_0 : i32, i32
  }
  func.func @transform_3(%arg0: i32) -> (i32, i32) {
    %c0_i32 = arith.constant 0 : i32
    %c0_i32_0 = arith.constant 0 : i32
    %c0_i32_1 = arith.constant 0 : i32
    return %c0_i32, %c0_i32_0 : i32, i32
  }
  func.func @transform_4(%arg0: i32) -> (i32, i32) {
    %c0_i32 = arith.constant 0 : i32
    %c0_i32_0 = arith.constant 0 : i32
    %c0_i32_1 = arith.constant 0 : i32
    return %c0_i32, %c0_i32_0 : i32, i32
  }
  func.func @transform_5(%arg0: i32) -> (i32, i32) {
    %c0_i32 = arith.constant 0 : i32
    %c0_i32_0 = arith.constant 0 : i32
    %c0_i32_1 = arith.constant 0 : i32
    return %c0_i32, %c0_i32_0 : i32, i32
  }
  func.func @transform_6(%arg0: i32) -> (i32, i32) {
    %c0_i32 = arith.constant 0 : i32
    %c0_i32_0 = arith.constant 0 : i32
    %c0_i32_1 = arith.constant 0 : i32
    return %c0_i32, %c0_i32_0 : i32, i32
  }
  func.func @transform_7(%arg0: i32) -> (i32, i32) {
    %c0_i32 = arith.constant 0 : i32
    %c0_i32_0 = arith.constant 0 : i32
    return %arg0, %c0_i32 : i32, i32
  }
}

</mosaic_0001>

<bundles_post_ra>
// kernel: tpu_custom_call.1
= control target key start
LH: loop header
LB: loop body
LE: loop exit
PB: predicated region body
PF: predicated region fallthrough
CT: control target
= control target key end

     0   :  { %vm40_vm0 = vcmask 261120   ;;  %s586_s0 = inlined_call_operand.vmem [shape: f32[16,32], index: 0, kind: input, shape index: {}]   ;;  %s587_s1 = inlined_call_operand.vmem [shape: f32[32,48], index: 1, kind: input, shape index: {}]   ;;  %s588_s2 = inlined_call_operand.vmem [shape: f32[1,48], index: 2, kind: input, shape index: {}]   ;;  %s589_s3 = inlined_call_operand.vmem [shape: f32[32,48], index: 3, kind: input, shape index: {}]   ;;  %s590_s4 = inlined_call_operand.vmem [shape: f32[1,48], index: 4, kind: input, shape index: {}]   ;;  %s591_s5 = inlined_call_operand.vmem [shape: f32[48,32], index: 5, kind: input, shape index: {}]   ;;  %s592_s6 = inlined_call_operand.vmem [shape: f32[1,32], index: 6, kind: input, shape index: {}]   ;;  %s593_s7 = inlined_call_operand.hbm [shape: f32[16,32], index: 7, kind: output, shape index: {}]  }
   0x1   :  { %v29_v0 = vld [vmem:[%s587_s1] sm:$0xff]  ;;  %v30_v1 = vld [vmem:[%s587_s1 + $0x8] sm:$0xff]  ;;  %v31_v2 = vld [vmem:[%s587_s1 + $0x10] sm:$0xff] }
   0x2   :  { %v405_v3 = vpack.c.bf16 %v30_v1, %v29_v0  ;;  %v32_v4 = vld [vmem:[%s587_s1 + $0x18] sm:$0xff]  ;;  %v27_v5 = vld [vmem:[%s586_s0] sm:$0xff]  ;;  %v123_v8 = vld [vmem:[%s589_s3 + $0x8] sm:$0xff] }
   0x3   :  { %v409_v6 = vpack.c.bf16 %v32_v4, %v31_v2  ;;  %376 = vmatprep.mubr.msk.f32.mxu1 %vm40_vm0, %v27_v5  ;;  %v122_v7 = vld [vmem:[%s589_s3] sm:$0xff] }
   0x4   :  { %406 = vmatprep.subr.bf16.mxu1 %v405_v3 }
   0x5   :  { %12 = vsyncpa [#allocation3], 0  ;;  %408 = vmatpush3.bf16.msra.mxu1 %v405_v3  ;;  %v413_v9 = vpack.c.bf16 %v123_v8, %v122_v7  ;;  %v124_v10 = vld [vmem:[%s589_s3 + $0x10] sm:$0xff]  ;;  %v125_v11 = vld [vmem:[%s589_s3 + $0x18] sm:$0xff]  ;;  %vm237_vm1 = vcmask 392192   ;;  %s468_s11 = smov [#allocation2]  }
   0x6   :  { %410 = vmatprep.subr.bf16.mxu1 %v409_v6  ;;  %v28_v12 = vld [vmem:[%s586_s0 + $0x8] sm:$0xff]  ;;  %v417_v13 = vpack.c.bf16 %v125_v11, %v124_v10  ;;  %v224_v14 = vld [vmem:[%s591_s5] sm:$0xff]  ;;  %v226_v17 = vld [vmem:[%s591_s5 + $0x10] sm:$0xff]  ;;  %s326_s12 = sshll.u32 %s468_s11, 4  ;;  %s327_s12 = int_to_ptr.vmem [resolvable:$true] %s326_s12 }
   0x7   :  { %v225_v15 = vld [vmem:[%s591_s5 + $0x8] sm:$0xff]  ;;  %v227_v18 = vld [vmem:[%s591_s5 + $0x18] sm:$0xff]  ;;  %v228_v20 = vld [vmem:[%s591_s5 + $0x20] sm:$0xff]  ;;  %p449_p1 = scmp.lt.s32.totalorder %s327_s12, %s327_s12 }
   0x8   :  { %v421_v16 = vpack.c.bf16 %v225_v15, %v224_v14  ;;  %v425_v19 = vpack.c.bf16 %v227_v18, %v226_v17  ;;  %v229_v21 = vld [vmem:[%s591_s5 + $0x28] sm:$0xff]  ;;  %v337_v23 = vld [vmem:[%s588_s2] ss:$0 sm:$0xff] }
   0x9   :  { %412 = vmatpush3.bf16.msra.mxu1 %v409_v6  ;;  %v429_v22 = vpack.c.bf16 %v229_v21, %v228_v20  ;;  %v340_v36 = vld [vmem:[%s590_s4] ss:$0 sm:$0xff]  ;;  %s444_s4 = scalar_lea.vmem %s327_s12, 256 }
   0xa   :  { %414 = vmatprep.subr.bf16.mxu1 %v413_v9  ;;  %422 = vmatprep.subr.bf16.mxu0 %v421_v16  ;;  %v345_v45 = vld [vmem:[%s592_s6] ss:$0 sm:$0xff]  ;;  %p445_p0 = scmp.ne.s32.totalorder %s327_s12, %s444_s4  ;;  %p450_p2 = scmp.lt.s32.totalorder %s444_s4, %s444_s4 }
   0xb   :  { %424 = vmatpush3.bf16.msra.mxu0 %v421_v16 }
   0xc   :  { %377 = vmatmul.mubr.msk.f32.vlgmr.msra.gmra.mrb[0].mxu1 %vm40_vm0, %v28_v12  ;;  %426 = vmatprep.subr.bf16.mxu0 %v425_v19  ;;  %p451_p3 = por %p450_p2, %p449_p1 }
   0xd   :  { %416 = vmatpush3.bf16.msra.mxu1 %v413_v9  ;;  %387 = vmatprep.mubr.msk.f32.mxu1 %vm40_vm0, %v27_v5 }
   0xe   :  { %418 = vmatprep.subr.bf16.mxu1 %v417_v13  ;;  %p452_p4 = pnand %p451_p3, %p445_p0 }
   0xf   :  { %428 = vmatpush3.bf16.msra.mxu0 %v425_v19 }
  0x10   :  { %430 = vmatprep.subr.bf16.mxu0 %v429_v22 }
  0x11   :  { %420 = vmatpush3.bf16.msra.mxu1 %v417_v13 }
  0x13   :  { %432 = vmatpush3.bf16.msra.mxu0 %v429_v22 }
  0x14   :  { %388 = vmatmul.mubr.msk.f32.vlgmr.msra.gmra.mrb[2].mxu1 %vm40_vm0, %v28_v12 }
  0xdf   :  { %v378_v24 = vpop.f32.mrb[0].mxu1 }
  0xe0   :  { %v119_v25 = vadd.f32 %v378_v24, %v337_v23  ;;  %v113_v26 = vpop.f32.mrb[1].mxu1 }
  0xe1   :  { %v114_v27 = vadd.f32 %v337_v23, %v113_v26 }
  0xe2   :  { %v344_v28 = vmul.f32 -1.442695, %v119_v25 }
  0xe3   :  { %v343_v29 = vmul.f32 -1.442695, %v114_v27 }
  0xe4   :  { %436 = vpow2.f32 %v344_v28 }
  0xe5   :  { %438 = vpow2.f32 %v343_v29 }
  0xe7   :  { %v389_v30 = vpop.f32.mrb[2].mxu1 }
  0xe8   :  { %v199_v31 = vpop.f32.mrb[3].mxu1  ;;  %v205_v37 = vadd.f32 %v389_v30, %v340_v36 }
  0xe9   :  { %v200_v39 = vadd.f32 %v340_v36, %v199_v31 }
  0xee   :  { %v437_v32 = vpop.eup %436 }
  0xef   :  { %v439_v33 = vpop.eup %438  ;;  %v215_v34 = vadd.f32 1.0, %v437_v32 }
  0xf0   :  { %v214_v35 = vadd.f32 1.0, %v439_v33 }
  0xf1   :  { %440 = vrcp.f32 %v215_v34 }
  0xf2   :  { %442 = vrcp.f32 %v214_v35 }
  0xfb   :  { %v441_v38 = vpop.eup %440 }
  0xfc   :  { %v443_v40 = vpop.eup %442  ;;  %v221_v41 = vmul.f32 %v441_v38, %v119_v25 }
  0xfd   :  { %v220_v42 = vmul.f32 %v443_v40, %v114_v27 }
  0xfe   :  { %v223_v43 = vmul.f32 %v221_v41, %v205_v37 }
  0xff   :  { %v222_v44 = vmul.f32 %v220_v42, %v200_v39 }
 0x101   :  { %402 = vmatprep.mubr.msk.f32.mxu0 %vm237_vm1, %v222_v44 }
 0x102   :  { %403 = vmatmul.mubr.msk.f32.vlgmr.msra.gmra.mrb[0].mxu0 %vm237_vm1, %v223_v43 }
 0x1d5   :  { %v404_v46 = vpop.f32.mrb[0].mxu0 }
 0x1d6   :  { %v316_v47 = vadd.f32 %v404_v46, %v345_v45  ;;  %v310_v48 = vpop.f32.mrb[1].mxu0 }
 0x1d7   :  { %v311_v49 = vadd.f32 %v345_v45, %v310_v48 }
 0x1d8   :  { %320 = vst.msk [vmem:[#allocation2 + $0x8] sm:$0xff] %vm40_vm0, %v316_v47 }
 0x1d9   :  { %319 = vst.msk [vmem:[#allocation2] sm:$0xff] %vm40_vm0, %v311_v49 }
 0x1da   :  { %455 = shalt.err (!%p452_p4)
}
 0x1db   :  { %s456_s14 = scalar_lea.hbm %s593_s7, 256 }
 0x1dc   :  { %p457_p5 = scmp.ne.s32.totalorder %s593_s7, %s456_s14  ;;  %p460_p6 = scmp.lt.u32.totalorder %s456_s14, %s593_s7 }
 0x1de   :  { %p462_p7 = pnand %p460_p6, %p457_p5 }
 0x1e0   :  { %465 = shalt.err (!%p462_p7)
}
 0x1e1   :  { %s469_s18 = smov 128   ;;  %s470_s19 = smov 8  }
 0x1e2   :  { %332 = dma.vmem_to_hbm [thread:$0]  %s327_s12, 256, %s593_s7, [#allocation3], %s469_s18, %s469_s18, %s470_s19  }
 0x1e3   :  { %466 = dma.done.wait [#allocation3], 256  }
 0x1e4   :  { %467 = vsyncadd [#allocation3], 4294967040 }
 0x1e5   :  { %336 = vsyncpa [#allocation3], 1 }

</bundles_post_ra>
